<compile_context>
chip_gen: v5e
topology: v5e:2x2
jax: 0.10.0
libtpu: 0.0.40
codegen_flags: <defaults>
</compile_context>

<pallas_src>
import jax
import jax.numpy as jnp
import numpy as np
from jax.experimental import pallas as pl
from jax.experimental.pallas import tpu as pltpu


def _mshf_kernel(bxx_ref, byy_ref, bxy_ref, x_ref, o_ref):
    # x_ref: (1, Tc, H, W) input block; bias refs: (Tc, 1, 1); o_ref: (1, Tc, H, W)
    x = x_ref[0].astype(jnp.float32)          # (Tc, H, W)
    Tc, H, W = x.shape

    zcol = jnp.zeros((Tc, H, 1), jnp.float32)
    zrow = jnp.zeros((Tc, 1, W), jnp.float32)

    # Zero-halo shifted neighbours, built in VMEM (no HBM pad pass).
    left  = jnp.concatenate([zcol, x[:, :, :W - 1]], axis=2)   # x[i, j-1]
    right = jnp.concatenate([x[:, :, 1:], zcol], axis=2)       # x[i, j+1]
    up    = jnp.concatenate([zrow, x[:, :H - 1, :]], axis=1)   # x[i-1, j]
    down  = jnp.concatenate([x[:, 1:, :], zrow], axis=1)       # x[i+1, j]

    # Depthwise 3x3 stencils (PyTorch conv = cross-correlation):
    #   grad_xx: [[0,0,0],[1,-2,1],[0,0,0]]
    #   grad_yy: [[0,1,0],[0,-2,0],[0,1,0]]
    #   grad_xy: [[1,0,-1],[0,0,0],[-1,0,1]]
    m2c = -2.0 * x
    fxx = left + right + m2c + bxx_ref[...]
    fyy = up + down + m2c + byy_ref[...]

    # fxy = ul - ur - dl + dr = up_shift(left - right) - down_shift(left - right)
    dlr = left - right
    ul_minus_ur = jnp.concatenate([zrow, dlr[:, :H - 1, :]], axis=1)
    dl_minus_dr = jnp.concatenate([dlr[:, 1:, :], zrow], axis=1)
    fxy = ul_minus_ur - dl_minus_dr + bxy_ref[...]

    s = fxx + fyy
    d = fxx - fyy
    hessian = 0.5 * (s + jnp.sqrt(d * d + 4.0 * (fxy * fxy)))
    o_ref[0] = hessian.astype(o_ref.dtype)


def _pick_tc(C, H, W, itemsize, budget_bytes=8 << 20):
    """Largest channel-block divisor whose double-buffered in+out fits budget."""
    per_ch = 4 * H * W * itemsize  # (in + out) x double-buffered, per channel
    best = 1
    for d in range(1, C + 1):
        if C % d == 0 and d * per_ch <= budget_bytes:
            best = d
    return best


def mshf_forward(x, bias_xx, bias_yy, bias_xy):
    """MSHF forward. x: (B, C, H, W) float32 NCHW; biases: (C,)."""
    B, C, H, W = x.shape
    tc = _pick_tc(C, H, W, x.dtype.itemsize)
    # Keep at least 2 grid steps so both v7x TensorCores stay busy.
    if B * (C // tc) < 2 and tc > 1:
        divs = [d for d in range(1, tc) if C % d == 0]
        if divs:
            tc = divs[-1]

    bxx3 = bias_xx.reshape(C, 1, 1).astype(jnp.float32)
    byy3 = bias_yy.reshape(C, 1, 1).astype(jnp.float32)
    bxy3 = bias_xy.reshape(C, 1, 1).astype(jnp.float32)

    bias_spec = pl.BlockSpec((tc, 1, 1), lambda b, cb: (cb, 0, 0))
    plane_spec = pl.BlockSpec((1, tc, H, W), lambda b, cb: (b, cb, 0, 0))

    return pl.pallas_call(
        _mshf_kernel,
        out_shape=jax.ShapeDtypeStruct((B, C, H, W), x.dtype),
        grid_spec=pl.GridSpec(
            grid=(B, C // tc),
            in_specs=[bias_spec, bias_spec, bias_spec, plane_spec],
            out_specs=plane_spec,
        ),
        compiler_params=pltpu.CompilerParams(
            dimension_semantics=("parallel", "parallel"),
            vmem_limit_bytes=32 * 1024 * 1024),
    )(bxx3, byy3, bxy3, x)


def mshf_reference(x, bias_xx, bias_yy, bias_xy):
    """Pure-JAX reference (pad-based stencil math)."""
    xp = jnp.pad(x, ((0, 0), (0, 0), (1, 1), (1, 1)))
    H, W = x.shape[2], x.shape[3]
    center = xp[:, :, 1:H + 1, 1:W + 1]
    left   = xp[:, :, 1:H + 1, 0:W]
    right  = xp[:, :, 1:H + 1, 2:W + 2]
    up     = xp[:, :, 0:H,     1:W + 1]
    down   = xp[:, :, 2:H + 2, 1:W + 1]
    ul     = xp[:, :, 0:H,     0:W]
    ur     = xp[:, :, 0:H,     2:W + 2]
    dl     = xp[:, :, 2:H + 2, 0:W]
    dr     = xp[:, :, 2:H + 2, 2:W + 2]
    bxx = bias_xx[None, :, None, None]
    byy = bias_yy[None, :, None, None]
    bxy = bias_xy[None, :, None, None]
    fxx = left - 2.0 * center + right + bxx
    fyy = up - 2.0 * center + down + byy
    fxy = ul - ur - dl + dr + bxy
    return 0.5 * (fxx + fyy + jnp.sqrt((fxx - fyy) ** 2 + 4.0 * fxy ** 2))


if __name__ == "__main__":
    key = jax.random.PRNGKey(0)
    B, C, H, W = 2, 4, 16, 16

    k_x, k_bxx, k_byy, k_bxy = jax.random.split(key, 4)
    x = jax.random.normal(k_x, (B, C, H, W), dtype=jnp.float32)

    # PyTorch Conv2d default bias init: U(-1/sqrt(fan_in), 1/sqrt(fan_in)),
    # fan_in = (in_channels/groups) * k * k = 9 -> bound = 1/3.
    bound = 1.0 / 3.0
    bias_xx = jax.random.uniform(k_bxx, (C,), jnp.float32, -bound, bound)
    bias_yy = jax.random.uniform(k_byy, (C,), jnp.float32, -bound, bound)
    bias_xy = jax.random.uniform(k_bxy, (C,), jnp.float32, -bound, bound)

    out = jax.block_until_ready(mshf_forward(x, bias_xx, bias_yy, bias_xy))

    ref = mshf_reference(x, bias_xx, bias_yy, bias_xy)
    np.testing.assert_allclose(np.asarray(out), np.asarray(ref),
                               rtol=1e-5, atol=1e-5)
    print("KERNEL_OK")
</pallas_src>

<mosaic_0001>
module attributes {stable_mosaic.version = 11 : i64} {
  func.func @_mshf_kernel(%arg0: i32, %arg1: i32, %arg2: memref<4x1x1xf32, #tpu.memory_space<vmem>>, %arg3: memref<4x1x1xf32, #tpu.memory_space<vmem>>, %arg4: memref<4x1x1xf32, #tpu.memory_space<vmem>>, %arg5: memref<1x4x16x16xf32, #tpu.memory_space<vmem>>, %arg6: memref<1x4x16x16xf32, #tpu.memory_space<vmem>>) attributes {dimension_semantics = [#tpu.dimension_semantics<parallel>, #tpu.dimension_semantics<parallel>], iteration_bounds = array<i64: 2, 1>, scalar_prefetch = 0 : i64, scratch_operands = 0 : i64, tpu.core_type = #tpu.core_type<tc>, window_params = [{transform_indices = @transform_0, window_bounds = array<i64: 4, 1, 1>}, {transform_indices = @transform_1, window_bounds = array<i64: 4, 1, 1>}, {transform_indices = @transform_2, window_bounds = array<i64: 4, 1, 1>}, {transform_indices = @transform_3, window_bounds = array<i64: 1, 4, 16, 16>}, {transform_indices = @transform_4, window_bounds = array<i64: 1, 4, 16, 16>}]} {
    %c0 = arith.constant 0 : index
    %c0_0 = arith.constant 0 : index
    %c0_1 = arith.constant 0 : index
    %c0_2 = arith.constant 0 : index
    %0 = vector.load %arg5[%c0, %c0_0, %c0_1, %c0_2] : memref<1x4x16x16xf32, #tpu.memory_space<vmem>>, vector<1x4x16x16xf32>
    %1 = vector.shape_cast %0 : vector<1x4x16x16xf32> to vector<4x16x16xf32>
    %cst = arith.constant 0.000000e+00 : f32
    %2 = vector.broadcast %cst : f32 to vector<4x16x1xf32>
    %cst_3 = arith.constant 0.000000e+00 : f32
    %3 = vector.broadcast %cst_3 : f32 to vector<4x1x16xf32>
    %4 = vector.extract_strided_slice %1 {offsets = [0, 0, 0], sizes = [4, 16, 15], strides = [1, 1, 1]} : vector<4x16x16xf32> to vector<4x16x15xf32>
    %5 = tpu.concatenate %2, %4 in 2 : vector<4x16x1xf32>, vector<4x16x15xf32> -> vector<4x16x16xf32>
    %6 = vector.extract_strided_slice %1 {offsets = [0, 0, 1], sizes = [4, 16, 15], strides = [1, 1, 1]} : vector<4x16x16xf32> to vector<4x16x15xf32>
    %7 = tpu.concatenate %6, %2 in 2 : vector<4x16x15xf32>, vector<4x16x1xf32> -> vector<4x16x16xf32>
    %8 = vector.extract_strided_slice %1 {offsets = [0, 0, 0], sizes = [4, 15, 16], strides = [1, 1, 1]} : vector<4x16x16xf32> to vector<4x15x16xf32>
    %9 = tpu.concatenate %3, %8 in 1 : vector<4x1x16xf32>, vector<4x15x16xf32> -> vector<4x16x16xf32>
    %10 = vector.extract_strided_slice %1 {offsets = [0, 1, 0], sizes = [4, 15, 16], strides = [1, 1, 1]} : vector<4x16x16xf32> to vector<4x15x16xf32>
    %11 = tpu.concatenate %10, %3 in 1 : vector<4x15x16xf32>, vector<4x1x16xf32> -> vector<4x16x16xf32>
    %cst_4 = arith.constant -2.000000e+00 : f32
    %12 = vector.broadcast %cst_4 : f32 to vector<4x16x16xf32>
    %13 = arith.mulf %12, %1 : vector<4x16x16xf32>
    %14 = arith.addf %5, %7 : vector<4x16x16xf32>
    %15 = arith.addf %14, %13 : vector<4x16x16xf32>
    %c0_5 = arith.constant 0 : index
    %c0_6 = arith.constant 0 : index
    %c0_7 = arith.constant 0 : index
    %16 = vector.load %arg2[%c0_5, %c0_6, %c0_7] : memref<4x1x1xf32, #tpu.memory_space<vmem>>, vector<4x1x1xf32>
    %17 = vector.broadcast %16 : vector<4x1x1xf32> to vector<4x16x16xf32>
    %18 = arith.addf %15, %17 : vector<4x16x16xf32>
    %19 = arith.addf %9, %11 : vector<4x16x16xf32>
    %20 = arith.addf %19, %13 : vector<4x16x16xf32>
    %c0_8 = arith.constant 0 : index
    %c0_9 = arith.constant 0 : index
    %c0_10 = arith.constant 0 : index
    %21 = vector.load %arg3[%c0_8, %c0_9, %c0_10] : memref<4x1x1xf32, #tpu.memory_space<vmem>>, vector<4x1x1xf32>
    %22 = vector.broadcast %21 : vector<4x1x1xf32> to vector<4x16x16xf32>
    %23 = arith.addf %20, %22 : vector<4x16x16xf32>
    %24 = arith.subf %5, %7 : vector<4x16x16xf32>
    %25 = vector.extract_strided_slice %24 {offsets = [0, 0, 0], sizes = [4, 15, 16], strides = [1, 1, 1]} : vector<4x16x16xf32> to vector<4x15x16xf32>
    %26 = tpu.concatenate %3, %25 in 1 : vector<4x1x16xf32>, vector<4x15x16xf32> -> vector<4x16x16xf32>
    %27 = vector.extract_strided_slice %24 {offsets = [0, 1, 0], sizes = [4, 15, 16], strides = [1, 1, 1]} : vector<4x16x16xf32> to vector<4x15x16xf32>
    %28 = tpu.concatenate %27, %3 in 1 : vector<4x15x16xf32>, vector<4x1x16xf32> -> vector<4x16x16xf32>
    %29 = arith.subf %26, %28 : vector<4x16x16xf32>
    %c0_11 = arith.constant 0 : index
    %c0_12 = arith.constant 0 : index
    %c0_13 = arith.constant 0 : index
    %30 = vector.load %arg4[%c0_11, %c0_12, %c0_13] : memref<4x1x1xf32, #tpu.memory_space<vmem>>, vector<4x1x1xf32>
    %31 = vector.broadcast %30 : vector<4x1x1xf32> to vector<4x16x16xf32>
    %32 = arith.addf %29, %31 : vector<4x16x16xf32>
    %33 = arith.addf %18, %23 : vector<4x16x16xf32>
    %34 = arith.subf %18, %23 : vector<4x16x16xf32>
    %35 = arith.mulf %34, %34 : vector<4x16x16xf32>
    %36 = arith.mulf %32, %32 : vector<4x16x16xf32>
    %cst_14 = arith.constant 4.000000e+00 : f32
    %37 = vector.broadcast %cst_14 : f32 to vector<4x16x16xf32>
    %38 = arith.mulf %37, %36 : vector<4x16x16xf32>
    %39 = arith.addf %35, %38 : vector<4x16x16xf32>
    %40 = math.sqrt %39 : vector<4x16x16xf32>
    %41 = arith.addf %33, %40 : vector<4x16x16xf32>
    %cst_15 = arith.constant 5.000000e-01 : f32
    %42 = vector.broadcast %cst_15 : f32 to vector<4x16x16xf32>
    %43 = arith.mulf %42, %41 : vector<4x16x16xf32>
    %c0_16 = arith.constant 0 : index
    %c0_17 = arith.constant 0 : index
    %c0_18 = arith.constant 0 : index
    %c0_19 = arith.constant 0 : index
    %44 = vector.load %arg6[%c0_16, %c0_17, %c0_18, %c0_19] : memref<1x4x16x16xf32, #tpu.memory_space<vmem>>, vector<1x4x16x16xf32>
    %45 = vector.shape_cast %44 : vector<1x4x16x16xf32> to vector<4x16x16xf32>
    %46 = vector.shape_cast %43 : vector<4x16x16xf32> to vector<1x4x16x16xf32>
    tpu.vector_store %arg6[%c0_16, %c0_17, %c0_18, %c0_19], %46 {strides = array<i32>} : memref<1x4x16x16xf32, #tpu.memory_space<vmem>>, vector<1x4x16x16xf32>,
    return
  }
  func.func @transform_0(%arg0: i32, %arg1: i32) -> (i32, i32, i32) {
    %c0_i32 = arith.constant 0 : i32
    %c0_i32_0 = arith.constant 0 : i32
    %c0_i32_1 = arith.constant 0 : i32
    return %arg1, %c0_i32, %c0_i32_0 : i32, i32, i32
  }
  func.func @transform_1(%arg0: i32, %arg1: i32) -> (i32, i32, i32) {
    %c0_i32 = arith.constant 0 : i32
    %c0_i32_0 = arith.constant 0 : i32
    %c0_i32_1 = arith.constant 0 : i32
    return %arg1, %c0_i32, %c0_i32_0 : i32, i32, i32
  }
  func.func @transform_2(%arg0: i32, %arg1: i32) -> (i32, i32, i32) {
    %c0_i32 = arith.constant 0 : i32
    %c0_i32_0 = arith.constant 0 : i32
    %c0_i32_1 = arith.constant 0 : i32
    return %arg1, %c0_i32, %c0_i32_0 : i32, i32, i32
  }
  func.func @transform_3(%arg0: i32, %arg1: i32) -> (i32, i32, i32, i32) {
    %c0_i32 = arith.constant 0 : i32
    %c0_i32_0 = arith.constant 0 : i32
    %c0_i32_1 = arith.constant 0 : i32
    return %arg0, %arg1, %c0_i32, %c0_i32_0 : i32, i32, i32, i32
  }
  func.func @transform_4(%arg0: i32, %arg1: i32) -> (i32, i32, i32, i32) {
    %c0_i32 = arith.constant 0 : i32
    %c0_i32_0 = arith.constant 0 : i32
    %c0_i32_1 = arith.constant 0 : i32
    return %arg0, %arg1, %c0_i32, %c0_i32_0 : i32, i32, i32, i32
  }
}

</mosaic_0001>

<bundles_post_ra>
// kernel: tpu_custom_call.1
= control target key start
LH: loop header
LB: loop body
LE: loop exit
PB: predicated region body
PF: predicated region fallthrough
CT: control target
= control target key end

     0   :  { %9 = vsyncpa [#allocation3], 0  ;;  %s1789_s0 = inlined_call_operand.vmem [shape: f32[4,1,1], index: 0, kind: input, shape index: {}]   ;;  %s1790_s1 = inlined_call_operand.vmem [shape: f32[4,1,1], index: 1, kind: input, shape index: {}]   ;;  %s1791_s2 = inlined_call_operand.vmem [shape: f32[4,1,1], index: 2, kind: input, shape index: {}]   ;;  %s1792_s3 = inlined_call_operand.hbm [shape: f32[2,4,16,16], index: 3, kind: input, shape index: {}]   ;;  %s1793_s4 = inlined_call_operand.hbm [shape: f32[2,4,16,16], index: 4, kind: output, shape index: {}]  }
   0x1   :  { %11 = vsyncpa [#allocation3 + $0x1], 0 }
   0x2   :  { %12 = vsyncpa [#allocation4], 0 }
   0x3   :  { %14 = vsyncpa [#allocation4 + $0x1], 0  ;;  %s1225_s15 = smov 0   ;;  %s1227_s16 = smov 0  }
   0x4   :  { %s1229_s17 = smov 0   ;;  %s1231_s18 = smov 0  }
   0x5   :  { %s1233_s19 = smov 0   ;;  %s1235_s20 = smov 0  }
   0x6 LB: > { %s959_s21 = sadd.s32 4294967295, %s1191_s20   ;;  %s960_s22 = sadd.s32 4294967294, %s1191_s20   ;;  %s1191_s20 = sphi %s1235_s20, %s20_s20   ;;  %s1187_s19 = sphi %s1233_s19, %s1802_s19   ;;  %s1183_s18 = sphi %s1231_s18, %s1801_s18   ;;  %s1179_s17 = sphi %s1229_s17, %s1800_s17   ;;  %s1175_s16 = sphi %s1227_s16, %s1799_s16   ;;  %s1171_s15 = sphi %s1225_s15, %s1798_s15  }
   0x7   : > { %s32_s23 = sadd.s32 1, %s1187_s19  ;;  %s119_s24 = sadd.s32 1, %s1179_s17 }
   0x8   : > { %p34_p0 = scmp.ge.s32.totalorder %s32_s23, 2  ;;  %p126_p1 = scmp.ne.s32.totalorder %s1179_s17, %s1175_s16 }
   0x9   : > { %p127_p2 = scmp.eq.s32.totalorder %s1191_s20, 0  ;;  %p132_p3 = scmp.ne.s32.totalorder %s1175_s16, %s1171_s15 }
   0xa   : > { %s1804_s23 = smov (%p34_p0, %s32_s23), 0  ;;  %p133_p5 = scmp.eq.s32.totalorder %s959_s21, 0 }
   0xb   : > { %p1266_p4 = por %p127_p2, %p126_p1  ;;  %s114_s26 = ssub.s32 %s1187_s19, %s1804_s23 }
   0xc   : > { %p158_p6 = scmp.eq.s32.totalorder %s959_s21, 1  ;;  %p117_p7 = scmp.eq.s32.totalorder %s114_s26, 0 }
   0xd   : > { %p1272_p8 = por %p133_p5, %p132_p3  ;;  %p164_p10 = scmp.eq.s32.totalorder %s960_s22, 1 }
   0xe   : > { %p1276_p9 = por %p158_p6, %p126_p1  ;;  %p965_p12 = scmp.ge.s32.totalorder %s1191_s20, 2 }
   0xf   : > { %s1281_s29 = scalar_select %p117_p7, %s1179_s17, %s119_s24  }
  0x10   : > { %p1283_p11 = por %p164_p10, %p132_p3  ;;  %p991_p13 = scmp.lt.s32.totalorder %s1191_s20, 2 }
  0x11   : > { %s208_s5 = sand.u32 1, %s1179_s17   ;;  %s977_s7 = sshll.u32 %s1187_s19, 6 }
  0x12   : > { %s966_s6 = sshll.u32 %s208_s5, 6  ;;  %s220_s10 = scalar_lea.hbm %s1792_s3, %s977_s7 }
  0x13   : > { %s212_s11 = scalar_lea.vmem [#allocation2], %s966_s6  ;;  %s221_s13 = sshll.u32 %s220_s10, 4  ;;  %s222_s13 = int_to_ptr.hbm [resolvable:$true] %s221_s13 }
  0x14   : > { %s223_s12 = sshll.u32 %s212_s11, 4  ;;  %p984_p0 = pnand %p991_p13, %p1266_p4  ;;  %s224_s12 = int_to_ptr.vmem [resolvable:$true] %s223_s12 }
  0x15   : > { %p969_p1 = scmp.ge.s32.totalorder %s1191_s20, 1  ;;  %s209_s14 = scalar_lea.sflag [#allocation3], %s208_s5 }
  0x16   : > { %s1193_s21 = smov 128   ;;  %s1194_s22 = smov 8  }
  0x17   : > { %986 = dma.hbm_to_vmem [thread:$0]  (!%p984_p0), %s222_s13, 1024, %s224_s12, %s209_s14, %s1193_s21, %s1193_s21, %s1194_s22  }
  0x18   : > { %p231_p2 = scmp.lt.s32.totalorder %s1191_s20, 3 }
  0x1a   : > { %p232_p3 = pnand %p969_p1, %p231_p2 }
  0x1b   : > { %s1299_s24 = sand.u32 (!%p232_p3), 1, %s1175_s16  }
  0x1c   : > { %235 = sbr.rel (%p232_p3) target bundleno = 264 (0x108), region = 36  ;;  %s970_s26 = sshll.u32 (!%p232_p3), %s1299_s24, 6 }
  0x1d   : > { %s238_s6 = scalar_lea.sflag (!%p232_p3), [#allocation3], %s1299_s24  ;;  %s241_s25 = scalar_lea.vmem (!%p232_p3), [#allocation2], %s970_s26 }
  0x21   : > { %1162 = dma.done.wait (%p1272_p8), %s238_s6, 1024  }
  0x22   : > { %1164 = vsyncadd (%p1272_p8), %s238_s6, 4294966272  ;;  %v1309_v0 = vld [vmem:[%s241_s25 + $0x20] sm:$0xff]  ;;  %v1311_v1 = vld [vmem:[%s241_s25 + $0x10] sm:$0xff]  ;;  %s1195_s5 = smov 1   ;;  %v1196_v3 = vmov 0   ;;  %s1197_s27 = smov 127  }
  0x23   : > { %v1313_v2 = vld [vmem:[%s241_s25] sm:$0xff]  ;;  %320 = vrot.lane.b32.xlu2 %v1309_v0, %s1195_s5  ;;  %316 = vrot.lane.b32.xlu1 %v1311_v1, %s1195_s5  ;;  %v1318_v4 = vld [vmem:[%s241_s25 + $0x28] sm:$0xff]  ;;  %vm369_vm0 = vcmask 121856   ;;  %vm336_vm1 = vcmask 7168   ;;  %vm378_vm2 = vcmask 1040384   ;;  %vm403_vm3 = vcmask 1046528  }
  0x24   : > { %312 = vrot.lane.b32.xlu0 %v1313_v2, %s1195_s5  ;;  %1049 = vset.pattern.permute.xlu2 %v1196_v3  ;;  %v1320_v5 = vld [vmem:[%s241_s25 + $0x18] sm:$0xff]  ;;  %v1322_v6 = vld [vmem:[%s241_s25 + $0x8] sm:$0xff]  ;;  %v1329_v8 = vld [vmem:[%s241_s25 + $0x30] sm:$0xff]  ;;  %v379_v35 = vrot.slane %v1313_v2, 7  ;;  %v404_v36 = vrot.slane %v1313_v2, 1  ;;  %v385_v41 = vrot.slane %v1309_v0, 7 }
  0x25   : > { %1048 = vset.pattern.permute.xlu1 %v1196_v3  ;;  %1050 = vset.pattern.permute.xlu0 %v1196_v3  ;;  %v1327_v7 = vld [vmem:[%s241_s25 + $0x38] sm:$0xff]  ;;  %v1051_v9 = vld [vmem:[%s1789_s0] ss:$0 sm:$0xff]  ;;  %v1052_v10 = vld [vmem:[%s1789_s0 + $0x1] ss:$0 sm:$0xff]  ;;  %v405_v34 = vrot.slane %v1322_v6, 1 }
  0x26   : > { %v1053_v11 = vld [vmem:[%s1789_s0 + $0x3] ss:$0 sm:$0xff]  ;;  %v1054_v12 = vld [vmem:[%s1790_s1] ss:$0 sm:$0xff]  ;;  %v1055_v13 = vld [vmem:[%s1789_s0 + $0x2] ss:$0 sm:$0xff] }
  0x27   : > { %v1056_v14 = vld [vmem:[%s1790_s1 + $0x1] ss:$0 sm:$0xff]  ;;  %v1057_v15 = vld [vmem:[%s1790_s1 + $0x2] ss:$0 sm:$0xff]  ;;  %v1058_v16 = vld [vmem:[%s1790_s1 + $0x3] ss:$0 sm:$0xff]  ;;  %v406_v45 = vsel %vm403_vm3, %v404_v36, %v405_v34 }
  0x28   : > { %v1059_v17 = vld [vmem:[%s1791_s2] ss:$0 sm:$0xff]  ;;  %v1060_v18 = vld [vmem:[%s1791_s2 + $0x1] ss:$0 sm:$0xff]  ;;  %v1061_v19 = vld [vmem:[%s1791_s2 + $0x2] ss:$0 sm:$0xff] }
  0x29   : > { %v1062_v20 = vld [vmem:[%s1791_s2 + $0x3] ss:$0 sm:$0xff]  ;;  %v380_v37 = vrot.slane %v1322_v6, 7  ;;  %v410_v42 = vrot.slane %v1309_v0, 1  ;;  %v411_v43 = vrot.slane %v1318_v4, 1  ;;  %v399_v44 = vsel %vm378_vm2, 0.0, %v379_v35 }
  0x2a   : > { %v386_v46 = vrot.slane %v1318_v4, 7  ;;  %v424_v48 = vsel %vm403_vm3, %v405_v34, 0.0  ;;  %v428_v51 = vmul.f32 -2.0, %v1313_v2  ;;  %v488_v54 = vadd.f32 %v406_v45, %v399_v44  ;;  %s1683_s6 = scalar_lea.vmem [#allocation5], %s970_s26  ;;  %s978_s26 = sshll.u32 %s1183_s18, 6 }
  0x2b   : > { %322 = vrot.lane.b32.xlu2 %v1318_v4, %s1195_s5  ;;  %318 = vrot.lane.b32.xlu1 %v1320_v5, %s1195_s5  ;;  %v381_v49 = vsel %vm378_vm2, %v379_v35, %v380_v37  ;;  %v401_v55 = vsel %vm378_vm2, 0.0, %v385_v41  ;;  %v412_v56 = vsel %vm403_vm3, %v410_v42, %v411_v43  ;;  %v426_v61 = vsel %vm403_vm3, %v411_v43, 0.0  ;;  %s818_s8 = scalar_lea.sflag [#allocation4], %s1299_s24  ;;  %s1129_s13 = scalar_lea.hbm %s1793_s4, 128 }
  0x2c   : > { %314 = vrot.lane.b32.xlu0 %v1322_v6, %s1195_s5  ;;  %v489_v58 = vadd.f32 %v424_v48, %v381_v49  ;;  %v387_v60 = vsel %vm378_vm2, %v385_v41, %v386_v46  ;;  %v1420_v3 = vmul.f32 -2.0, %v1320_v5  ;;  %v383_v34 = vrot.slane %v1320_v5, 7 }
  0x2d   : > { %v382_v35 = vrot.slane %v1311_v1, 7  ;;  %v388_v46 = vrot.slane %v1329_v8, 7  ;;  %v413_v48 = vrot.slane %v1329_v8, 1  ;;  %vm808_vm4 = vcmask 130048  }
  0x33   : > { %326 = vrot.lane.b32.xlu1 %v1327_v7, %s1195_s5  ;;  %345 = vrot.lane.b32.xlu2 %v1313_v2, %s1197_s27 }
  0x34   : > { %324 = vrot.lane.b32.xlu0 %v1329_v8, %s1195_s5  ;;  %s832_s5 = scalar_lea.hbm %s1793_s4, %s978_s26 }
  0x35   : > { %s835_s7 = sshll.u32 %s832_s5, 4  ;;  %s836_s7 = int_to_ptr.hbm [resolvable:$true] %s835_s7 }
  0x36   : > { %s1123_s9 = sshra.s32 %s836_s7, 4  ;;  %s1124_s9 = int_to_ptr.hbm [resolvable:$true] %s1123_s9 }
  0x37   : > { %s1125_s10 = scalar_lea.hbm %s1124_s9, 64  ;;  %p1130_p7 = scmp.lt.s32.totalorder %s1124_s9, %s1793_s4 }
  0x38   : > { %p1126_p4 = scmp.ne.s32.totalorder %s1124_s9, %s1125_s10  ;;  %p1131_p8 = scmp.lt.s32.totalorder %s1129_s13, %s1125_s10 }
  0x3a   : > { %p1127_p5 = pnand %p1126_p4, %p1276_p9  ;;  %p1132_p10 = por %p1131_p8, %p1130_p7 }
  0x3b   : > { %349 = vrot.lane.b32.xlu1 %v1311_v1, %s1197_s27  ;;  %351 = vrot.lane.b32.xlu2 %v1320_v5, %s1197_s27 }
  0x3c   : > { %347 = vrot.lane.b32.xlu0 %v1322_v6, %s1197_s27  ;;  %p1128_p6 = pneg %p1127_p5 }
  0x3e   : > { %p1133_p13 = pnand %p1132_p10, %p1128_p6 }
  0x43   : > { %355 = vrot.lane.b32.xlu1 %v1318_v4, %s1197_s27  ;;  %357 = vrot.lane.b32.xlu2 %v1329_v8, %s1197_s27 }
  0x44   : > { %353 = vrot.lane.b32.xlu0 %v1309_v0, %s1197_s27 }
  0x4b   : > { %465 = vperm.xlu1 %1048, %v1051_v9   ;;  %469 = vperm.xlu2 %1049, %v1052_v10  }
  0x4c   : > { %359 = vrot.lane.b32.xlu0 %v1327_v7, %s1197_s27  ;;  %s833_s27 = sshll.u32 %s1683_s6, 4  ;;  %s834_s27 = int_to_ptr.vmem [resolvable:$true] %s833_s27 }
  0x53   : > { %477 = vperm.xlu1 %1048, %v1053_v11   ;;  %517 = vperm.xlu2 %1049, %v1054_v12   ;;  %v1427_v11 = vmul.f32 -2.0, %v1329_v8  ;;  %v1430_v12 = vmul.f32 -2.0, %v1322_v6 }
  0x54   : > { %473 = vperm.xlu0 %1050, %v1055_v13   ;;  %v492_v13 = vadd.f32 %v412_v56, %v401_v55 }
  0x5b   : > { %521 = vperm.xlu1 %1048, %v1056_v14   ;;  %525 = vperm.xlu2 %1049, %v1057_v15   ;;  %v1434_v15 = vmul.f32 -2.0, %v1311_v1 }
  0x5c   : > { %529 = vperm.xlu0 %1050, %v1058_v16   ;;  %v1437_v16 = vmul.f32 -2.0, %v1318_v4 }
  0x63   : > { %625 = vperm.xlu1 %1048, %v1059_v17   ;;  %629 = vperm.xlu2 %1049, %v1060_v18   ;;  %v493_v17 = vadd.f32 %v426_v61, %v387_v60 }
  0x64   : > { %633 = vperm.xlu0 %1050, %v1061_v19   ;;  %v496_v19 = vadd.f32 %v488_v54, %v428_v51 }
  0x6b   : > { %637 = vperm.xlu1 %1048, %v1062_v20   ;;  %v497_v20 = vadd.f32 %v489_v58, %v1430_v12 }
  0x7d   : > { %v321_v21 = vpop.permute.xlu2 %320 }
  0x7e   : > { %v1413_v62 = vsel %vm336_vm1, 0.0, %v321_v21  ;;  %v1443_v21 = vmul.f32 -2.0, %v1309_v0  ;;  %v1459_v0 = vadd.f32 %v493_v17, %v1437_v16 }
  0x85   : > { %v323_v22 = vpop.permute.xlu2 %322 }
  0x86   : > { %v1416_v63 = vsel %vm336_vm1, 0.0, %v323_v22 }
  0x8d   : > { %v346_v23 = vpop.permute.xlu2 %345 }
  0x8e   : > { %v370_v39 = vsel %vm369_vm0, %v346_v23, 0.0 }
  0x95   : > { %v317_v24 = vpop.permute.xlu1 %316  ;;  %v352_v25 = vpop.permute.xlu2 %351 }
  0x96   : > { %v313_v26 = vpop.permute.xlu0 %312  ;;  %v373_v50 = vsel %vm369_vm0, %v352_v25, 0.0  ;;  %v339_v14 = vsel %vm336_vm1, 0.0, %v317_v24 }
  0x97   : > { %v337_v40 = vsel %vm336_vm1, 0.0, %v313_v26 }
  0x98   : > { %v1397_v47 = vsub.f32 %v337_v40, %v370_v39  ;;  %v436_v57 = vadd.f32 %v370_v39, %v337_v40  ;;  %v407_v40 = vrot.slane %v1311_v1, 1 }
  0x9a   : > { %v556_v2 = vrot.slane %v1397_v47, 7  ;;  %v1439_v18 = vadd.f32 %v436_v57, %v428_v51  ;;  %v580_v6 = vrot.slane %v1397_v47, 1  ;;  %v414_v51 = vrot.slane %v1327_v7, 1 }
  0x9c   : > { %v1450_v24 = vsel %vm378_vm2, 0.0, %v556_v2 }
  0x9d   : > { %v319_v27 = vpop.permute.xlu1 %318  ;;  %v358_v29 = vpop.permute.xlu2 %357 }
  0x9e   : > { %v1377_v28 = vpop.permute.xlu0 %314  ;;  %v340_v53 = vsel %vm336_vm1, 0.0, %v319_v27  ;;  %v376_v25 = vsel %vm369_vm0, %v358_v29, 0.0  ;;  %v1456_v27 = vadd.f32 %v492_v13, %v1443_v21 }
  0x9f   : > { %v1424_v10 = vsub.f32 %v340_v53, %v373_v50  ;;  %v439_v22 = vadd.f32 %v373_v50, %v340_v53  ;;  %v338_v36 = vsel %vm336_vm1, 0.0, %v1377_v28  ;;  %v384_v50 = vsel %vm378_vm2, %v382_v35, %v383_v34 }
  0xa1   : > { %v584_v4 = vrot.slane %v1424_v10, 1  ;;  %v447_v41 = vadd.f32 %v439_v22, %v1420_v3  ;;  %v560_v42 = vrot.slane %v1424_v10, 7  ;;  %v389_v10 = vrot.slane %v1327_v7, 7 }
  0xa3   : > { %v601_v45 = vsel %vm403_vm3, %v584_v4, 0.0 }
  0xa5   : > { %v1379_v30 = vpop.permute.xlu1 %326  ;;  %v1381_v32 = vpop.permute.xlu2 %469 }
  0xa6   : > { %v325_v31 = vpop.permute.xlu0 %324  ;;  %v1480_v28 = vsel %vm336_vm1, 0.0, %v1379_v30  ;;  %v400_v30 = vsel %vm378_vm2, 0.0, %v382_v35  ;;  %v1493_v56 = vadd.f32 %v1381_v32, %v447_v41 }
  0xa7   : > { %v343_v26 = vsel %vm336_vm1, 0.0, %v325_v31  ;;  %v1469_v31 = vmul.f32 -2.0, %v1327_v7 }
  0xa8   : > { %v442_v43 = vadd.f32 %v376_v25, %v343_v26 }
  0xaa   : > { %v1496_v8 = vadd.f32 %v442_v43, %v1427_v11  ;;  %v427_v43 = vsel %vm403_vm3, %v414_v51, 0.0 }
  0xad   : > { %v350_v33 = vpop.permute.xlu1 %349  ;;  %v1403_v52 = vpop.permute.xlu2 %517 }
  0xae   : > { %v1387_v38 = vpop.permute.xlu0 %347  ;;  %v372_v23 = vsel %vm369_vm0, %v350_v33, 0.0  ;;  %v408_v33 = vrot.slane %v1320_v5, 1  ;;  %v1474_v5 = vsub.f32 %v343_v26, %v376_v25  ;;  %v1501_v60 = vadd.f32 %v1403_v52, %v496_v19 }
  0xaf   : > { %v542_v37 = vsub.f32 %v339_v14, %v372_v23  ;;  %v371_v1 = vsel %vm369_vm0, %v1387_v38, 0.0  ;;  %v438_v57 = vadd.f32 %v372_v23, %v339_v14  ;;  %v402_v25 = vsel %vm378_vm2, 0.0, %v388_v46 }
  0xb0   : > { %v425_v49 = vsel %vm403_vm3, %v408_v33, 0.0  ;;  %v409_v55 = vsel %vm403_vm3, %v407_v40, %v408_v33  ;;  %v565_v38 = vrot.slane %v1474_v5, 7  ;;  %v589_v58 = vrot.slane %v1474_v5, 1 }
  0xb1   : > { %v559_v53 = vrot.slane %v542_v37, 7  ;;  %v583_v54 = vrot.slane %v542_v37, 1  ;;  %v541_v61 = vsub.f32 %v338_v36, %v371_v1  ;;  %v437_v13 = vadd.f32 %v371_v1, %v338_v36 }
  0xb2   : > { %v490_v17 = vadd.f32 %v409_v55, %v400_v30  ;;  %v491_v22 = vadd.f32 %v425_v49, %v384_v50  ;;  %v415_v23 = vsel %vm403_vm3, %v413_v48, %v414_v51  ;;  %v446_v19 = vadd.f32 %v438_v57, %v1434_v15 }
  0xb3   : > { %v561_v26 = vsel %vm378_vm2, %v559_v53, %v560_v42  ;;  %v577_v34 = vsel %vm378_vm2, 0.0, %v559_v53  ;;  %v585_v33 = vsel %vm403_vm3, %v583_v54, %v584_v4  ;;  %v1513_v35 = vadd.f32 %v1403_v52, %v497_v20 }
  0xb4   : > { %v557_v40 = vrot.slane %v541_v61, 7  ;;  %v581_v41 = vrot.slane %v541_v61, 1  ;;  %v390_v42 = vsel %vm378_vm2, %v388_v46, %v389_v10  ;;  %v606_v48 = vsub.f32 %v577_v34, %v585_v33 }
  0xb5   : > { %v1408_v59 = vpop.permute.xlu1 %355  ;;  %v526_v39 = vpop.permute.xlu2 %525  ;;  %v607_v1 = vsub.f32 %v561_v26, %v601_v45  ;;  %v498_v52 = vadd.f32 %v490_v17, %v1434_v15  ;;  %v494_v20 = vadd.f32 %v415_v23, %v402_v25  ;;  %v445_v49 = vadd.f32 %v437_v13, %v1430_v12 }
  0xb6   : > { %v1422_v9 = vpop.permute.xlu0 %353  ;;  %v375_v7 = vsel %vm369_vm0, %v1408_v59, 0.0  ;;  %v499_v50 = vadd.f32 %v491_v22, %v1420_v3  ;;  %v1529_v53 = vadd.f32 %v1381_v32, %v446_v19  ;;  %v495_v30 = vadd.f32 %v427_v43, %v390_v42 }
  0xb7   : > { %v374_v36 = vsel %vm369_vm0, %v1422_v9, 0.0  ;;  %v545_v59 = vsub.f32 %v1416_v63, %v375_v7  ;;  %v1532_v51 = vadd.f32 %v526_v39, %v1456_v27  ;;  %v1535_v15 = vadd.f32 %v526_v39, %v1459_v0 }
  0xb8   : > { %v544_v9 = vsub.f32 %v1413_v62, %v374_v36  ;;  %v558_v12 = vsel %vm378_vm2, %v556_v2, %v557_v40  ;;  %v582_v3 = vsel %vm403_vm3, %v580_v6, %v581_v41  ;;  %v441_v32 = vadd.f32 %v375_v7, %v1416_v63 }
  0xb9   : > { %v440_v45 = vadd.f32 %v374_v36, %v1413_v62  ;;  %v1546_v55 = vadd.f32 %v494_v20, %v1427_v11  ;;  %v600_v27 = vsel %vm403_vm3, %v581_v41, 0.0  ;;  %v563_v57 = vrot.slane %v545_v59, 7 }
  0xba   : > { %v587_v0 = vrot.slane %v545_v59, 1  ;;  %v562_v39 = vrot.slane %v544_v9, 7  ;;  %v586_v62 = vrot.slane %v544_v9, 1  ;;  %v503_v22 = vadd.f32 %v495_v30, %v1469_v31 }
  0xbb   : > { %v448_v25 = vadd.f32 %v440_v45, %v1443_v21  ;;  %v579_v30 = vsel %vm378_vm2, 0.0, %v565_v38 }
  0xbc   : > { %v578_v23 = vsel %vm378_vm2, 0.0, %v562_v39 }
  0xbd   : > { %v1466_v29 = vpop.permute.xlu1 %465  ;;  %v630_v4 = vpop.permute.xlu2 %629 }
  0xbe   : > { %v1476_v44 = vpop.permute.xlu0 %359  ;;  %v642_v54 = vadd.f32 %v630_v4, %v606_v48  ;;  %v643_v46 = vadd.f32 %v630_v4, %v607_v1  ;;  %v1557_v11 = vadd.f32 %v1466_v29, %v1439_v18  ;;  %v1560_v17 = vadd.f32 %v1466_v29, %v445_v49 }
  0xbf   : > { %v377_v61 = vsel %vm369_vm0, %v1476_v44, 0.0  ;;  %v449_v44 = vadd.f32 %v441_v32, %v1437_v16  ;;  %v564_v18 = vsel %vm378_vm2, %v562_v39, %v563_v57  ;;  %v602_v29 = vsel %vm403_vm3, %v587_v0, 0.0 }
  0xc0   : > { %v674_v10 = vmul.f32 %v642_v54, %v642_v54  ;;  %v675_v47 = vmul.f32 %v643_v46, %v643_v46  ;;  %v547_v33 = vsub.f32 %v1480_v28, %v377_v61  ;;  %v656_v21 = vsub.f32 %v1557_v11, %v1501_v60 }
  0xc1   : > { %v657_v40 = vsub.f32 %v1560_v17, %v1513_v35  ;;  %v588_v4 = vsel %vm403_vm3, %v586_v62, %v587_v0  ;;  %v604_v48 = vsub.f32 %v1450_v24, %v582_v3  ;;  %v605_v1 = vsub.f32 %v558_v12, %v600_v27 }
  0xc2   : > { %v682_v19 = vmul.f32 4.0, %v674_v10  ;;  %v683_v7 = vmul.f32 4.0, %v675_v47  ;;  %v566_v20 = vrot.slane %v547_v33, 7  ;;  %v590_v49 = vrot.slane %v547_v33, 1 }
  0xc3   : > { %v609_v54 = vsub.f32 %v564_v18, %v602_v29  ;;  %v664_v32 = vmul.f32 %v656_v21, %v656_v21  ;;  %v665_v24 = vmul.f32 %v657_v40, %v657_v40 }
  0xc4   : > { %v567_v0 = vsel %vm378_vm2, %v565_v38, %v566_v20  ;;  %v591_v39 = vsel %vm403_vm3, %v589_v58, %v590_v49 }
  0xc5   : > { %v1508_v14 = vpop.permute.xlu1 %477  ;;  %v610_v21 = vsub.f32 %v579_v30, %v591_v39 }
  0xc6   : > { %v1519_v37 = vpop.permute.xlu0 %473  ;;  %v1614_v58 = vadd.f32 %v1508_v14, %v1496_v8 }
  0xc7   : > { %v1578_v41 = vadd.f32 %v1519_v37, %v448_v25  ;;  %v1588_v59 = vadd.f32 %v1519_v37, %v449_v44  ;;  %v603_v25 = vsel %vm403_vm3, %v590_v49, 0.0  ;;  %v1637_v49 = vadd.f32 %v1501_v60, %v1557_v11 }
  0xc8   : > { %v611_v40 = vsub.f32 %v567_v0, %v603_v25 }
  0xc9   : > { %v661_v57 = vsub.f32 %v1588_v59, %v1535_v15 }
  0xcb   : > { %v669_v29 = vmul.f32 %v661_v57, %v661_v57 }
  0xcd   : > { %v522_v2 = vpop.permute.xlu1 %521 }
  0xce   : > { %v1551_v13 = vadd.f32 %v522_v2, %v498_v52  ;;  %v1553_v6 = vadd.f32 %v522_v2, %v499_v50  ;;  %v530_v63 = vpop.permute.xlu0 %529  ;;  %v443_v52 = vadd.f32 %v377_v61, %v1480_v28  ;;  %v608_v50 = vsub.f32 %v578_v23, %v588_v4 }
  0xcf   : > { %v660_v28 = vsub.f32 %v1578_v41, %v1532_v51  ;;  %v1607_v44 = vadd.f32 %v530_v63, %v1546_v55 }
  0xd0   : > { %v658_v26 = vsub.f32 %v1529_v53, %v1551_v13  ;;  %v659_v34 = vsub.f32 %v1493_v56, %v1553_v6  ;;  %v451_v27 = vadd.f32 %v443_v52, %v1469_v31  ;;  %v1609_v31 = vadd.f32 %v530_v63, %v503_v22 }
  0xd1   : > { %v668_v62 = vmul.f32 %v660_v28, %v660_v28  ;;  %v662_v8 = vsub.f32 %v1614_v58, %v1607_v44  ;;  %v651_v30 = vadd.f32 %v1553_v6, %v1493_v56 }
  0xd2   : > { %v666_v36 = vmul.f32 %v658_v26, %v658_v26  ;;  %v667_v16 = vmul.f32 %v659_v34, %v659_v34  ;;  %v1617_v23 = vadd.f32 %v1508_v14, %v451_v27 }
  0xd3   : > { %v670_v11 = vmul.f32 %v662_v8, %v662_v8 }
  0xd4   : > { %v1581_v42 = vadd.f32 %v682_v19, %v666_v36  ;;  %v1583_v43 = vadd.f32 %v683_v7, %v667_v16  ;;  %v663_v4 = vsub.f32 %v1617_v23, %v1609_v31 }
  0xd5   : > { %v626_v9 = vpop.permute.xlu1 %625 }
  0xd6   : > { %1063 = vrsqrt.f32 %v1581_v42  ;;  %v634_v46 = vpop.permute.xlu0 %633  ;;  %v640_v12 = vadd.f32 %v626_v9, %v604_v48  ;;  %v641_v37 = vadd.f32 %v626_v9, %v605_v1  ;;  %v1641_v9 = vadd.f32 %v1513_v35, %v1560_v17 }
  0xd7   : > { %1065 = vrsqrt.f32 %v1583_v43  ;;  %v644_v3 = vadd.f32 %v634_v46, %v608_v50  ;;  %v645_v45 = vadd.f32 %v634_v46, %v609_v54  ;;  %v1646_v54 = vadd.f32 %v1532_v51, %v1578_v41 }
  0xd8   : > { %v672_v61 = vmul.f32 %v640_v12, %v640_v12  ;;  %v673_v2 = vmul.f32 %v641_v37, %v641_v37  ;;  %v650_v46 = vadd.f32 %v1551_v13, %v1529_v53  ;;  %vm727_vm5 = vcmp.eq.f32.partialorder %v1581_v42, inf }
  0xd9   : > { %v676_v10 = vmul.f32 %v644_v3, %v644_v3  ;;  %v677_v47 = vmul.f32 %v645_v45, %v645_v45  ;;  %vm729_vm6 = vcmp.eq.f32.partialorder %v1581_v42, 0.0  ;;  %v730_v53 = vand.u32 2147483648, %v1581_v42 }
  0xda   : > { %v680_v34 = vmul.f32 4.0, %v672_v61  ;;  %v681_v33 = vmul.f32 4.0, %v673_v2  ;;  %vm739_vm7 = vcmp.eq.f32.partialorder %v1583_v43, inf  ;;  %vm741_vm8 = vcmp.eq.f32.partialorder %v1583_v43, 0.0 }
  0xdb   : > { %v684_v38 = vmul.f32 4.0, %v676_v10  ;;  %v685_v18 = vmul.f32 4.0, %v677_v47  ;;  %v742_v27 = vand.u32 2147483648, %v1583_v43 }
  0xdc   : > { %v1064_v26 = vpop.eup %1063  ;;  %v1621_v22 = vadd.f32 %v680_v34, %v664_v32  ;;  %v1623_v19 = vadd.f32 %v681_v33, %v665_v24  ;;  %v671_v24 = vmul.f32 %v663_v4, %v663_v4 }
  0xdd   : > { %v1066_v5 = vpop.eup %1065  ;;  %v721_v55 = vmul.f32 %v1064_v26, %v1581_v42  ;;  %v1625_v7 = vadd.f32 %v684_v38, %v668_v62  ;;  %v638_v36 = vpop.permute.xlu1 %637  ;;  %v1632_v48 = vadd.f32 %v685_v18, %v669_v29 }
  0xde   : > { %v733_v63 = vmul.f32 %v1066_v5, %v1583_v43  ;;  %1067 = vrsqrt.f32 %v1621_v22  ;;  %v646_v52 = vadd.f32 %v638_v36, %v610_v21  ;;  %v647_v20 = vadd.f32 %v638_v36, %v611_v40 }
  0xdf   : > { %v722_v16 = vmul.f32 %v1064_v26, %v721_v55  ;;  %1069 = vrsqrt.f32 %v1623_v19  ;;  %vm703_vm9 = vcmp.eq.f32.partialorder %v1621_v22, inf  ;;  %vm705_vm10 = vcmp.eq.f32.partialorder %v1621_v22, 0.0 }
  0xe0   : > { %v734_v14 = vmul.f32 %v1066_v5, %v733_v63  ;;  %1071 = vrsqrt.f32 %v1625_v7  ;;  %v678_v17 = vmul.f32 %v646_v52, %v646_v52  ;;  %v679_v28 = vmul.f32 %v647_v20, %v647_v20 }
  0xe1   : > { %v723_v1 = vmul.f32 0.5, %v722_v16  ;;  %1073 = vrsqrt.f32 %v1632_v48  ;;  %vm715_vm11 = vcmp.eq.f32.partialorder %v1623_v19, inf  ;;  %vm717_vm12 = vcmp.eq.f32.partialorder %v1623_v19, 0.0 }
  0xe2   : > { %v735_v50 = vmul.f32 0.5, %v734_v14  ;;  %v686_v12 = vmul.f32 4.0, %v678_v17  ;;  %v687_v37 = vmul.f32 4.0, %v679_v28  ;;  %v718_v52 = vand.u32 2147483648, %v1623_v19 }
  0xe3   : > { %v724_v32 = vsub.f32 1.5, %v723_v1  ;;  %vm751_vm13 = vcmp.eq.f32.partialorder %v1625_v7, inf  ;;  %vm753_vm14 = vcmp.eq.f32.partialorder %v1625_v7, 0.0  ;;  %vm763_vm15 = vcmp.eq.f32.partialorder %v1632_v48, inf }
  0xe4   : > { %v736_v60 = vsub.f32 1.5, %v735_v50  ;;  %v1068_v51 = vpop.eup %1067  ;;  %v1667_v2 = vadd.f32 %v686_v12, %v670_v11  ;;  %v754_v11 = vand.u32 2147483648, %v1625_v7  ;;  %vm765_vm0 = vcmp.eq.f32.partialorder %v1632_v48, 0.0 }
  0xe5   : > { %v725_v35 = vmul.f32 %v1064_v26, %v724_v32  ;;  %v1070_v56 = vpop.eup %1069  ;;  %v697_v41 = vmul.f32 %v1068_v51, %v1621_v22  ;;  %v1674_v26 = vadd.f32 %v687_v37, %v671_v24 }
  0xe6   : > { %v737_v13 = vmul.f32 %v1066_v5, %v736_v60  ;;  %v1072_v3 = vpop.eup %1071  ;;  %v709_v57 = vmul.f32 %v1070_v56, %v1623_v19  ;;  %1075 = vrsqrt.f32 %v1667_v2  ;;  %vm775_vm1 = vcmp.eq.f32.partialorder %v1667_v2, inf }
  0xe7   : > { %v726_v6 = vmul.f32 %v725_v35, %v1581_v42  ;;  %v698_v39 = vmul.f32 %v1068_v51, %v697_v41  ;;  %v745_v61 = vmul.f32 %v1072_v3, %v1625_v7  ;;  %v1074_v10 = vpop.eup %1073  ;;  %1077 = vrsqrt.f32 %v1674_v26 }
  0xe8   : > { %v738_v45 = vmul.f32 %v737_v13, %v1583_v43  ;;  %v710_v25 = vmul.f32 %v1070_v56, %v709_v57  ;;  %v757_v55 = vmul.f32 %v1074_v10, %v1632_v48  ;;  %vm777_vm2 = vcmp.eq.f32.partialorder %v1667_v2, 0.0 }
  0xe9   : > { %v728_v0 = vsel %vm727_vm5, %v1581_v42, %v726_v6  ;;  %v699_v38 = vmul.f32 0.5, %v698_v39  ;;  %v746_v18 = vmul.f32 %v1072_v3, %v745_v61  ;;  %v653_v42 = vadd.f32 %v1535_v15, %v1588_v59 }
  0xea   : > { %v731_v47 = vsel %vm729_vm6, %v730_v53, %v728_v0  ;;  %v740_v62 = vsel %vm739_vm7, %v1583_v43, %v738_v45  ;;  %v711_v29 = vmul.f32 0.5, %v710_v25  ;;  %v758_v21 = vmul.f32 %v1074_v10, %v757_v55 }
  0xeb   : > { %v743_v34 = vsel %vm741_vm8, %v742_v27, %v740_v62  ;;  %v794_v33 = vadd.f32 %v731_v47, %v650_v46  ;;  %v700_v36 = vsub.f32 1.5, %v699_v38  ;;  %v747_v43 = vmul.f32 0.5, %v746_v18 }
  0xec   : > { %v795_v5 = vadd.f32 %v743_v34, %v651_v30  ;;  %v712_v8 = vsub.f32 1.5, %v711_v29  ;;  %v706_v15 = vand.u32 2147483648, %v1621_v22  ;;  %v759_v4 = vmul.f32 0.5, %v758_v21  ;;  %v1076_v50 = vpop.eup %1075 }
  0xed   : > { %v802_v63 = vmul.f32 0.5, %v794_v33  ;;  %v701_v40 = vmul.f32 %v1068_v51, %v700_v36  ;;  %v748_v14 = vsub.f32 1.5, %v747_v43  ;;  %v769_v24 = vmul.f32 %v1076_v50, %v1667_v2  ;;  %v1078_v51 = vpop.eup %1077 }
  0xee   : > { %v803_v16 = vmul.f32 0.5, %v795_v5  ;;  %v713_v59 = vmul.f32 %v1070_v56, %v712_v8  ;;  %v760_v30 = vsub.f32 1.5, %v759_v4  ;;  %v781_v37 = vmul.f32 %v1078_v51, %v1674_v26 }
  0xef   : > { %811 = vst.msk [vmem:[%s1683_s6 + $0x10] sm:$0xff] %vm808_vm4, %v802_v63  ;;  %v702_v1 = vmul.f32 %v701_v40, %v1621_v22  ;;  %v749_v20 = vmul.f32 %v1072_v3, %v748_v14  ;;  %v770_v6 = vmul.f32 %v1076_v50, %v769_v24  ;;  %v654_v33 = vadd.f32 %v1607_v44, %v1614_v58 }
  0xf0   : > { %812 = vst.msk [vmem:[%s1683_s6 + $0x18] sm:$0xff] %vm808_vm4, %v803_v16  ;;  %v714_v46 = vmul.f32 %v713_v59, %v1623_v19  ;;  %v761_v28 = vmul.f32 %v1074_v10, %v760_v30  ;;  %vm787_vm3 = vcmp.eq.f32.partialorder %v1674_v26, inf  ;;  %v790_v29 = vand.u32 2147483648, %v1674_v26 }
  0xf1   : > { %v704_v32 = vsel %vm703_vm9, %v1621_v22, %v702_v1  ;;  %v750_v60 = vmul.f32 %v749_v20, %v1625_v7  ;;  %v655_v44 = vadd.f32 %v1609_v31, %v1617_v23  ;;  %vm789_vm5 = vcmp.eq.f32.partialorder %v1674_v26, 0.0 }
  0xf2   : > { %v707_v35 = vsel %vm705_vm10, %v706_v15, %v704_v32  ;;  %v716_v17 = vsel %vm715_vm11, %v1623_v19, %v714_v46  ;;  %v762_v12 = vmul.f32 %v761_v28, %v1632_v48  ;;  %v766_v19 = vand.u32 2147483648, %v1632_v48 }
  0xf3   : > { %v719_v53 = vsel %vm717_vm12, %v718_v52, %v716_v17  ;;  %v792_v13 = vadd.f32 %v707_v35, %v1637_v49  ;;  %v752_v56 = vsel %vm751_vm13, %v1625_v7, %v750_v60  ;;  %v771_v49 = vmul.f32 0.5, %v770_v6 }
  0xf4   : > { %v793_v22 = vadd.f32 %v719_v53, %v1641_v9  ;;  %v755_v41 = vsel %vm753_vm14, %v754_v11, %v752_v56  ;;  %v764_v57 = vsel %vm763_vm15, %v1632_v48, %v762_v12  ;;  %v782_v7 = vmul.f32 %v1078_v51, %v781_v37 }
  0xf5   : > { %v800_v3 = vmul.f32 0.5, %v792_v13  ;;  %v796_v45 = vadd.f32 %v755_v41, %v1646_v54  ;;  %v767_v9 = vsel %vm765_vm0, %v766_v19, %v764_v57  ;;  %v772_v39 = vsub.f32 1.5, %v771_v49 }
  0xf6   : > { %v801_v27 = vmul.f32 0.5, %v793_v22  ;;  %v797_v61 = vadd.f32 %v767_v9, %v653_v42  ;;  %v783_v10 = vmul.f32 0.5, %v782_v7  ;;  %v778_v48 = vand.u32 2147483648, %v1667_v2 }
  0xf7   : > { %809 = vst.msk [vmem:[%s1683_s6] sm:$0xff] %vm808_vm4, %v800_v3  ;;  %v804_v0 = vmul.f32 0.5, %v796_v45  ;;  %v773_v54 = vmul.f32 %v1076_v50, %v772_v39 }
  0xf8   : > { %810 = vst.msk [vmem:[%s1683_s6 + $0x8] sm:$0xff] %vm808_vm4, %v801_v27  ;;  %v805_v47 = vmul.f32 0.5, %v797_v61  ;;  %v784_v62 = vsub.f32 1.5, %v783_v10 }
  0xf9   : > { %813 = vst.msk [vmem:[%s1683_s6 + $0x20] sm:$0xff] %vm808_vm4, %v804_v0  ;;  %v774_v25 = vmul.f32 %v773_v54, %v1667_v2 }
  0xfa   : > { %814 = vst.msk [vmem:[%s1683_s6 + $0x28] sm:$0xff] %vm808_vm4, %v805_v47  ;;  %v785_v34 = vmul.f32 %v1078_v51, %v784_v62 }
  0xfb   : > { %v776_v38 = vsel %vm775_vm1, %v1667_v2, %v774_v25 }
  0xfc   : > { %v779_v18 = vsel %vm777_vm2, %v778_v48, %v776_v38  ;;  %v786_v5 = vmul.f32 %v785_v34, %v1674_v26 }
  0xfd   : > { %v798_v55 = vadd.f32 %v779_v18, %v654_v33 }
  0xfe   : > { %v788_v58 = vsel %vm787_vm3, %v1674_v26, %v786_v5 }
  0xff   : > { %v791_v2 = vsel %vm789_vm5, %v790_v29, %v788_v58  ;;  %v806_v42 = vmul.f32 0.5, %v798_v55 }
 0x100   : > { %v799_v63 = vadd.f32 %v791_v2, %v655_v44 }
 0x101   : > { %815 = vst.msk [vmem:[%s1683_s6 + $0x30] sm:$0xff] %vm808_vm4, %v806_v42 }
 0x102   : > { %v807_v36 = vmul.f32 0.5, %v799_v63 }
 0x104   : > { %816 = vst.msk [vmem:[%s1683_s6 + $0x38] sm:$0xff] %vm808_vm4, %v807_v36 }
 0x105   : > { %1136 = shalt.err (!%p1133_p13)
}
 0x106   : > { %s1198_s24 = smov 128   ;;  %s1199_s22 = smov 8  }
 0x107   : > { %981 = dma.vmem_to_hbm [thread:$0]  (%p1276_p9), %s834_s27, 1024, %s836_s7, %s818_s8, %s1198_s24, %s1198_s24, %s1199_s22  }
 0x108 PF: > { %s850_s6 = sand.u32 1, %s1171_s15   ;;  %p988_p0 = pnand %p965_p12, %p1283_p11 }
 0x109   : > { %s851_s26 = scalar_lea.sflag [#allocation4], %s850_s6 }
 0x10a   : > { %p989_p1 = pneg %p988_p0 }
 0x10c   : > { %1166 = dma.done.wait (%p989_p1), %s851_s26, 1024  }
 0x10d   : > { %1168 = vsyncadd (%p989_p1), %s851_s26, 4294966272  ;;  %s20_s20 = sadd.s32 1, %s1191_s20   ;;  %s1798_s15 = smov %s1175_s16 }
 0x10e   : > { %p17_p2 = scmp.ge.s32.totalorder %s20_s20, 4   ;;  %s1799_s16 = smov %s1179_s17 }
 0x10f   : > { %s1800_s17 = smov %s1281_s29  ;;  %s1801_s18 = smov %s1187_s19 }
 0x110   : > { %s1802_s19 = smov %s1804_s23  ;;  %19 = sbr.rel (!%p17_p2) target bundleno = 6 (0x6), region = 90 }
 0x115   :  { %857 = vsyncpa [#allocation3], 1 }
 0x116   :  { %859 = vsyncpa [#allocation3 + $0x1], 1 }
 0x117   :  { %860 = vsyncpa [#allocation4], 1 }
 0x118   :  { %862 = vsyncpa [#allocation4 + $0x1], 1 }

</bundles_post_ra>
